<compile_context>
chip_gen: v6e
topology: v6e:2x2x1
jax: 0.10.0
libtpu: 0.0.40
codegen_flags: <defaults>
</compile_context>

<pallas_src>
import functools

import jax
import jax.numpy as jnp
from jax.experimental import pallas as pl
from jax.experimental.pallas import tpu as pltpu


def _downsampler_kernel(ln_eps, n_heads, num_queries,
                        x_ref, qpad_ref, hmask_ref, wkv_ref, bkv_ref, wo_ref,
                        bo_ref, g_ref, beta_ref,
                        out_ref, ls_ref):
    bc, s_len, e = x_ref.shape          # batch chunk, source length, embed
    H, Q = n_heads, num_queries
    hd = e // H
    scale = 1.0 / float(hd) ** 0.5

    # ---- fused K/V projection for the whole batch chunk: one MXU matmul, 2E lanes ----
    x2d = x_ref[...].reshape(bc * s_len, e)
    kv = jnp.dot(x2d, wkv_ref[...], preferred_element_type=jnp.float32) + bkv_ref[...]

    qpad = qpad_ref[...]      # (H*Q, E)  block-diag padded, pre-projected learned queries
    hmask = hmask_ref[...]    # (H, E)    0/1 lane mask per head
    wo_t = wo_ref[...]        # (E, E)
    bo = bo_ref[...]          # (1, E)
    gamma = g_ref[...]        # (1, E)
    beta = beta_ref[...]      # (1, E)

    ls_acc = jnp.zeros((1, 1), jnp.float32)

    # Static loop over the (tiny) batch chunk; K/V were already projected jointly.
    for b in range(bc):
        rows = slice(b * s_len, (b + 1) * s_len)
        kb = kv[rows, :e]                                            # (S, E)
        vb = kv[rows, e:]                                            # (S, E)

        # Per-head scores for ALL heads in one matmul: row h*Q+q of qpad is zero outside
        # head-h lanes, so (qpad @ kb^T)[h*Q+q, s] == q_h(q) . k_h(s).
        s = jax.lax.dot_general(qpad, kb, (((1,), (1,)), ((), ())),
                                preferred_element_type=jnp.float32) * scale  # (H*Q, S)
        s = s - jnp.max(s, axis=-1, keepdims=True)
        p = jnp.exp(s)
        p = p * pl.reciprocal(jnp.sum(p, axis=-1, keepdims=True), approx=True)

        # attn @ V for all heads: one matmul; block h carries head-h's context in its
        # head-h lanes (other lanes are discarded by the mask below).
        ctx = jnp.dot(p, vb, preferred_element_type=jnp.float32)     # (H*Q, E)

        # "Concat heads" = pick head-h lanes of block h (sublane-aligned Q-row slices,
        # VPU mask-mul + add; no lane shuffles), then one out-projection matmul.
        ctx_c = jnp.zeros((Q, e), jnp.float32)
        p_sum = jnp.zeros((Q, s_len), jnp.float32)
        for h in range(H):
            blk = slice(h * Q, (h + 1) * Q)
            ctx_c = ctx_c + ctx[blk, :] * hmask[h:h + 1, :]
            p_sum = p_sum + p[blk, :]

        o = jnp.dot(ctx_c, wo_t, preferred_element_type=jnp.float32) + bo   # (Q, E)

        # LayerNorm over the embed dim (biased variance, eps like PyTorch).
        mu = jnp.mean(o, axis=-1, keepdims=True)
        var = jnp.mean((o - mu) ** 2, axis=-1, keepdims=True)
        o = (o - mu) * jax.lax.rsqrt(var + ln_eps)
        o = o * gamma + beta
        out_ref[b] = o.astype(out_ref.dtype)

        # attn weights averaged over heads (average_attn_weights=True default);
        # accumulate sum of log(attn + 1e-8); final mean taken on the host.
        attn_avg = p_sum * (1.0 / H)                                  # (Q, S)
        ls_rows = jnp.sum(jnp.log(attn_avg + 1e-8), axis=-1, keepdims=True)  # (Q, 1)
        ls_acc = ls_acc + jnp.sum(ls_rows, axis=0, keepdims=True)     # (1, 1)

    ls_ref[0] = ls_acc


def learned_downsampler(x, params, *, n_heads=4, ln_eps=1e-5, num_batch_chunks=None):
    B, S, E = x.shape
    Q = params["queries"].shape[0]
    assert E % n_heads == 0
    hd = E // n_heads

    # Batch-chunked grid: whole batch per invocation by default (best on v5e/v6e, one
    # TensorCore); for B >= 4 (even) use 2 parallel chunks so both v7x TCs get work.
    if num_batch_chunks is None:
        num_batch_chunks = 2 if (B >= 4 and B % 2 == 0) else 1
    assert B % num_batch_chunks == 0
    BC = B // num_batch_chunks

    # Hoisted, batch-invariant learned-query projection (done ONCE, not per grid step).
    qp = jnp.dot(params["queries"], params["wq_t"],
                 preferred_element_type=jnp.float32) + params["bq"]          # (Q, E)

    # 0/1 lane mask per head and the zero-padded block-diagonal query layout:
    # q_pad[h*Q + q, :] keeps only head-h lanes of qp[q, :].
    head_mask = (jnp.arange(E)[None, :] // hd
                 == jnp.arange(n_heads)[:, None]).astype(jnp.float32)        # (H, E)
    q_pad = (qp[None, :, :] * head_mask[:, None, :]).reshape(n_heads * Q, E)  # (H*Q, E)

    flops = (2 * B * S * E * (2 * E)              # fused K/V projection
             + 2 * B * (n_heads * Q) * E * S      # attention scores (padded-Q matmul)
             + 2 * B * (n_heads * Q) * S * E      # attn @ V
             + 2 * B * Q * E * E)                 # out projection
    transcendentals = (B * n_heads * Q * S        # exp
                       + B * Q * S                # log
                       + B * n_heads * Q          # reciprocal
                       + B * Q)                   # rsqrt
    bytes_accessed = 4 * (x.size + B * Q * E + num_batch_chunks
                          + n_heads * Q * E + n_heads * E
                          + E * 2 * E + 2 * E + E * E + 3 * E)

    kernel = functools.partial(_downsampler_kernel, ln_eps, n_heads, Q)

    out, logsum = pl.pallas_call(
        kernel,
        out_shape=(
            jax.ShapeDtypeStruct((B, Q, E), x.dtype),
            jax.ShapeDtypeStruct((num_batch_chunks, 1, 1), jnp.float32),
        ),
        grid=(num_batch_chunks,),
        in_specs=[
            pl.BlockSpec((BC, S, E), lambda i: (i, 0, 0)),            # x (batch chunk)
            pl.BlockSpec((n_heads * Q, E), lambda i: (0, 0)),         # padded queries
            pl.BlockSpec((n_heads, E), lambda i: (0, 0)),             # head lane mask
            pl.BlockSpec((E, 2 * E), lambda i: (0, 0)),               # fused [Wk|Wv]^T
            pl.BlockSpec((1, 2 * E), lambda i: (0, 0)),               # fused [bk|bv]
            pl.BlockSpec((E, E), lambda i: (0, 0)),                   # Wo^T
            pl.BlockSpec((1, E), lambda i: (0, 0)),                   # bo
            pl.BlockSpec((1, E), lambda i: (0, 0)),                   # ln gamma
            pl.BlockSpec((1, E), lambda i: (0, 0)),                   # ln beta
        ],
        out_specs=(
            pl.BlockSpec((BC, Q, E), lambda i: (i, 0, 0)),
            pl.BlockSpec((1, 1, 1), lambda i: (i, 0, 0)),
        ),
        compiler_params=pltpu.CompilerParams(dimension_semantics=("parallel",)),
        cost_estimate=pl.CostEstimate(flops=flops,
                                      transcendentals=transcendentals,
                                      bytes_accessed=bytes_accessed),
    )(x, q_pad, head_mask, params["wkv_t"], params["bkv"], params["wo_t"],
      params["bo"], params["ln_gamma"], params["ln_beta"])

    # log_prob = mean over all (B, Q, S) elements of log(attn + 1e-8)
    log_prob = jnp.sum(logsum) / float(B * Q * S)
    return out, log_prob


def init_params(key, num_queries, embed_dim):
    E = embed_dim
    ks = jax.random.split(key, 5)
    # nn.MultiheadAttention: in_proj_weight (3E, E), in_proj_bias (3E,)
    in_proj_w = jax.random.normal(ks[0], (3 * E, E), jnp.float32) * 0.1
    in_proj_b = jax.random.normal(ks[1], (3 * E,), jnp.float32) * 0.1
    wq, wk, wv = jnp.split(in_proj_w, 3, axis=0)
    bq, bk, bv = jnp.split(in_proj_b, 3)
    # out_proj: Linear(E, E)
    wo = jax.random.normal(ks[2], (E, E), jnp.float32) * 0.1
    bo = jax.random.normal(ks[3], (E,), jnp.float32) * 0.1
    # learned queries: Parameter randn(num_queries, E)
    queries = jax.random.normal(ks[4], (num_queries, E), jnp.float32)
    return dict(
        queries=queries,
        wq_t=jnp.asarray(wq.T), bq=bq.reshape(1, E),
        # fused K/V projection: one (E, 2E) weight + (1, 2E) bias -> single MXU matmul
        wkv_t=jnp.concatenate([jnp.asarray(wk.T), jnp.asarray(wv.T)], axis=1),
        bkv=jnp.concatenate([bk, bv]).reshape(1, 2 * E),
        wo_t=jnp.asarray(wo.T), bo=bo.reshape(1, E),
        ln_gamma=jnp.ones((1, E), jnp.float32),
        ln_beta=jnp.zeros((1, E), jnp.float32),
    )


if __name__ == "__main__":
    B, S, E = 2, 16, 32      # batch, source seq len, embed_dim
    Q = 8                    # num_queries
    n_heads = 4

    key = jax.random.PRNGKey(0)
    k_x, k_p = jax.random.split(key)
    x = jax.random.normal(k_x, (B, S, E), jnp.float32)
    params = init_params(k_p, Q, E)

    out, log_prob = jax.jit(
        functools.partial(learned_downsampler, n_heads=n_heads)
    )(x, params)
    jax.block_until_ready((out, log_prob))

    assert out.shape == (B, Q, E)
    assert log_prob.shape == ()
    assert bool(jnp.all(jnp.isfinite(out)))
    assert bool(jnp.isfinite(log_prob))
    print("KERNEL_OK")
</pallas_src>

<mosaic_0001>
module attributes {stable_mosaic.version = 11 : i64} {
  func.func @_downsampler_kernel(%arg0: i32, %arg1: memref<2x16x32xf32, #tpu.memory_space<vmem>>, %arg2: memref<32x32xf32, #tpu.memory_space<vmem>>, %arg3: memref<4x32xf32, #tpu.memory_space<vmem>>, %arg4: memref<32x64xf32, #tpu.memory_space<vmem>>, %arg5: memref<1x64xf32, #tpu.memory_space<vmem>>, %arg6: memref<32x32xf32, #tpu.memory_space<vmem>>, %arg7: memref<1x32xf32, #tpu.memory_space<vmem>>, %arg8: memref<1x32xf32, #tpu.memory_space<vmem>>, %arg9: memref<1x32xf32, #tpu.memory_space<vmem>>, %arg10: memref<2x8x32xf32, #tpu.memory_space<vmem>>, %arg11: memref<1x1x1xf32, #tpu.memory_space<vmem>>) attributes {dimension_semantics = [#tpu.dimension_semantics<parallel>], iteration_bounds = array<i64: 1>, scalar_prefetch = 0 : i64, scratch_operands = 0 : i64, tpu.core_type = #tpu.core_type<tc>, window_params = [{transform_indices = @transform_0, window_bounds = array<i64: 2, 16, 32>}, {pipeline_mode = #tpu.pipeline_mode<synchronous>, transform_indices = @transform_1, window_bounds = array<i64: 32, 32>}, {pipeline_mode = #tpu.pipeline_mode<synchronous>, transform_indices = @transform_2, window_bounds = array<i64: 4, 32>}, {pipeline_mode = #tpu.pipeline_mode<synchronous>, transform_indices = @transform_3, window_bounds = array<i64: 32, 64>}, {pipeline_mode = #tpu.pipeline_mode<synchronous>, transform_indices = @transform_4, window_bounds = array<i64: 1, 64>}, {pipeline_mode = #tpu.pipeline_mode<synchronous>, transform_indices = @transform_5, window_bounds = array<i64: 32, 32>}, {pipeline_mode = #tpu.pipeline_mode<synchronous>, transform_indices = @transform_6, window_bounds = array<i64: 1, 32>}, {pipeline_mode = #tpu.pipeline_mode<synchronous>, transform_indices = @transform_7, window_bounds = array<i64: 1, 32>}, {pipeline_mode = #tpu.pipeline_mode<synchronous>, transform_indices = @transform_8, window_bounds = array<i64: 1, 32>}, {transform_indices = @transform_9, window_bounds = array<i64: 2, 8, 32>}, {transform_indices = @transform_10, window_bounds = array<i64: 1, 1, 1>}]} {
    %c0 = arith.constant 0 : index
    %c0_0 = arith.constant 0 : index
    %c0_1 = arith.constant 0 : index
    %0 = vector.load %arg1[%c0, %c0_0, %c0_1] : memref<2x16x32xf32, #tpu.memory_space<vmem>>, vector<2x16x32xf32>
    %1 = vector.shape_cast %0 : vector<2x16x32xf32> to vector<32x32xf32>
    %c0_2 = arith.constant 0 : index
    %c0_3 = arith.constant 0 : index
    %2 = vector.load %arg4[%c0_2, %c0_3] : memref<32x64xf32, #tpu.memory_space<vmem>>, vector<32x64xf32>
    %cst = arith.constant dense<0.000000e+00> : vector<32x64xf32>
    %3 = tpu.matmul %1, %2, %cst {dimension_numbers = #tpu.dot_dimension_numbers<[1], [0], [0], [1], [0, 0, 1, 1], [], []>} : vector<32x32xf32>, vector<32x64xf32>, vector<32x64xf32> -> vector<32x64xf32>
    %c0_4 = arith.constant 0 : index
    %c0_5 = arith.constant 0 : index
    %4 = vector.load %arg5[%c0_4, %c0_5] : memref<1x64xf32, #tpu.memory_space<vmem>>, vector<1x64xf32>
    %5 = vector.broadcast %4 : vector<1x64xf32> to vector<32x64xf32>
    %6 = arith.addf %3, %5 : vector<32x64xf32>
    %c0_6 = arith.constant 0 : index
    %c0_7 = arith.constant 0 : index
    %7 = vector.load %arg2[%c0_6, %c0_7] : memref<32x32xf32, #tpu.memory_space<vmem>>, vector<32x32xf32>
    %c0_8 = arith.constant 0 : index
    %c0_9 = arith.constant 0 : index
    %8 = vector.load %arg3[%c0_8, %c0_9] : memref<4x32xf32, #tpu.memory_space<vmem>>, vector<4x32xf32>
    %c0_10 = arith.constant 0 : index
    %c0_11 = arith.constant 0 : index
    %9 = vector.load %arg6[%c0_10, %c0_11] : memref<32x32xf32, #tpu.memory_space<vmem>>, vector<32x32xf32>
    %c0_12 = arith.constant 0 : index
    %c0_13 = arith.constant 0 : index
    %10 = vector.load %arg7[%c0_12, %c0_13] : memref<1x32xf32, #tpu.memory_space<vmem>>, vector<1x32xf32>
    %c0_14 = arith.constant 0 : index
    %c0_15 = arith.constant 0 : index
    %11 = vector.load %arg8[%c0_14, %c0_15] : memref<1x32xf32, #tpu.memory_space<vmem>>, vector<1x32xf32>
    %c0_16 = arith.constant 0 : index
    %c0_17 = arith.constant 0 : index
    %12 = vector.load %arg9[%c0_16, %c0_17] : memref<1x32xf32, #tpu.memory_space<vmem>>, vector<1x32xf32>
    %cst_18 = arith.constant 0.000000e+00 : f32
    %13 = vector.broadcast %cst_18 : f32 to vector<1x1xf32>
    %14 = vector.extract_strided_slice %6 {offsets = [0, 0], sizes = [16, 32], strides = [1, 1]} : vector<32x64xf32> to vector<16x32xf32>
    %15 = vector.extract_strided_slice %6 {offsets = [0, 32], sizes = [16, 32], strides = [1, 1]} : vector<32x64xf32> to vector<16x32xf32>
    %cst_19 = arith.constant dense<0.000000e+00> : vector<32x16xf32>
    %16 = tpu.matmul %7, %14, %cst_19 {dimension_numbers = #tpu.dot_dimension_numbers<[1], [1], [0], [0], [0, 0, 1, 0], [], []>} : vector<32x32xf32>, vector<16x32xf32>, vector<32x16xf32> -> vector<32x16xf32>
    %cst_20 = arith.constant 0.353553385 : f32
    %17 = vector.broadcast %cst_20 : f32 to vector<32x16xf32>
    %18 = arith.mulf %16, %17 : vector<32x16xf32>
    %cst_21 = arith.constant dense<0xFF800000> : vector<32xf32>
    %19 = vector.multi_reduction <maximumf>, %18, %cst_21 [1] : vector<32x16xf32> to vector<32xf32>
    %20 = vector.shape_cast %19 : vector<32xf32> to vector<32x1xf32>
    %21 = vector.broadcast %20 : vector<32x1xf32> to vector<32x16xf32>
    %22 = arith.subf %18, %21 : vector<32x16xf32>
    %23 = math.exp %22 : vector<32x16xf32>
    %cst_22 = arith.constant dense<0.000000e+00> : vector<32xf32>
    %24 = vector.multi_reduction <add>, %23, %cst_22 [1] : vector<32x16xf32> to vector<32xf32>
    %25 = vector.shape_cast %24 : vector<32xf32> to vector<32x1xf32>
    %26 = tpu.reciprocal %25 {approx = true} : vector<32x1xf32> -> vector<32x1xf32>
    %27 = vector.broadcast %26 : vector<32x1xf32> to vector<32x16xf32>
    %28 = arith.mulf %23, %27 : vector<32x16xf32>
    %cst_23 = arith.constant dense<0.000000e+00> : vector<32x32xf32>
    %29 = tpu.matmul %28, %15, %cst_23 {dimension_numbers = #tpu.dot_dimension_numbers<[1], [0], [0], [1], [0, 0, 1, 1], [], []>} : vector<32x16xf32>, vector<16x32xf32>, vector<32x32xf32> -> vector<32x32xf32>
    %cst_24 = arith.constant 0.000000e+00 : f32
    %30 = vector.broadcast %cst_24 : f32 to vector<8x32xf32>
    %cst_25 = arith.constant 0.000000e+00 : f32
    %31 = vector.broadcast %cst_25 : f32 to vector<8x16xf32>
    %32 = vector.extract_strided_slice %29 {offsets = [0, 0], sizes = [8, 32], strides = [1, 1]} : vector<32x32xf32> to vector<8x32xf32>
    %33 = vector.extract_strided_slice %8 {offsets = [0, 0], sizes = [1, 32], strides = [1, 1]} : vector<4x32xf32> to vector<1x32xf32>
    %34 = vector.broadcast %33 : vector<1x32xf32> to vector<8x32xf32>
    %35 = arith.mulf %32, %34 : vector<8x32xf32>
    %36 = arith.addf %30, %35 : vector<8x32xf32>
    %37 = vector.extract_strided_slice %28 {offsets = [0, 0], sizes = [8, 16], strides = [1, 1]} : vector<32x16xf32> to vector<8x16xf32>
    %38 = arith.addf %31, %37 : vector<8x16xf32>
    %39 = vector.extract_strided_slice %29 {offsets = [8, 0], sizes = [8, 32], strides = [1, 1]} : vector<32x32xf32> to vector<8x32xf32>
    %40 = vector.extract_strided_slice %8 {offsets = [1, 0], sizes = [1, 32], strides = [1, 1]} : vector<4x32xf32> to vector<1x32xf32>
    %41 = vector.broadcast %40 : vector<1x32xf32> to vector<8x32xf32>
    %42 = arith.mulf %39, %41 : vector<8x32xf32>
    %43 = arith.addf %36, %42 : vector<8x32xf32>
    %44 = vector.extract_strided_slice %28 {offsets = [8, 0], sizes = [8, 16], strides = [1, 1]} : vector<32x16xf32> to vector<8x16xf32>
    %45 = arith.addf %38, %44 : vector<8x16xf32>
    %46 = vector.extract_strided_slice %29 {offsets = [16, 0], sizes = [8, 32], strides = [1, 1]} : vector<32x32xf32> to vector<8x32xf32>
    %47 = vector.extract_strided_slice %8 {offsets = [2, 0], sizes = [1, 32], strides = [1, 1]} : vector<4x32xf32> to vector<1x32xf32>
    %48 = vector.broadcast %47 : vector<1x32xf32> to vector<8x32xf32>
    %49 = arith.mulf %46, %48 : vector<8x32xf32>
    %50 = arith.addf %43, %49 : vector<8x32xf32>
    %51 = vector.extract_strided_slice %28 {offsets = [16, 0], sizes = [8, 16], strides = [1, 1]} : vector<32x16xf32> to vector<8x16xf32>
    %52 = arith.addf %45, %51 : vector<8x16xf32>
    %53 = vector.extract_strided_slice %29 {offsets = [24, 0], sizes = [8, 32], strides = [1, 1]} : vector<32x32xf32> to vector<8x32xf32>
    %54 = vector.extract_strided_slice %8 {offsets = [3, 0], sizes = [1, 32], strides = [1, 1]} : vector<4x32xf32> to vector<1x32xf32>
    %55 = vector.broadcast %54 : vector<1x32xf32> to vector<8x32xf32>
    %56 = arith.mulf %53, %55 : vector<8x32xf32>
    %57 = arith.addf %50, %56 : vector<8x32xf32>
    %58 = vector.extract_strided_slice %28 {offsets = [24, 0], sizes = [8, 16], strides = [1, 1]} : vector<32x16xf32> to vector<8x16xf32>
    %59 = arith.addf %52, %58 : vector<8x16xf32>
    %cst_26 = arith.constant dense<0.000000e+00> : vector<8x32xf32>
    %60 = tpu.matmul %57, %9, %cst_26 {dimension_numbers = #tpu.dot_dimension_numbers<[1], [0], [0], [1], [0, 0, 1, 1], [], []>} : vector<8x32xf32>, vector<32x32xf32>, vector<8x32xf32> -> vector<8x32xf32>
    %61 = vector.broadcast %10 : vector<1x32xf32> to vector<8x32xf32>
    %62 = arith.addf %60, %61 : vector<8x32xf32>
    %cst_27 = arith.constant dense<0.000000e+00> : vector<8xf32>
    %63 = vector.multi_reduction <add>, %62, %cst_27 [1] : vector<8x32xf32> to vector<8xf32>
    %64 = vector.shape_cast %63 : vector<8xf32> to vector<8x1xf32>
    %cst_28 = arith.constant 3.200000e+01 : f32
    %65 = vector.broadcast %cst_28 : f32 to vector<8x1xf32>
    %66 = arith.divf %64, %65 : vector<8x1xf32>
    %67 = vector.broadcast %66 : vector<8x1xf32> to vector<8x32xf32>
    %68 = arith.subf %62, %67 : vector<8x32xf32>
    %69 = arith.mulf %68, %68 : vector<8x32xf32>
    %cst_29 = arith.constant dense<0.000000e+00> : vector<8xf32>
    %70 = vector.multi_reduction <add>, %69, %cst_29 [1] : vector<8x32xf32> to vector<8xf32>
    %71 = vector.shape_cast %70 : vector<8xf32> to vector<8x1xf32>
    %cst_30 = arith.constant 3.200000e+01 : f32
    %72 = vector.broadcast %cst_30 : f32 to vector<8x1xf32>
    %73 = arith.divf %71, %72 : vector<8x1xf32>
    %74 = vector.broadcast %66 : vector<8x1xf32> to vector<8x32xf32>
    %75 = arith.subf %62, %74 : vector<8x32xf32>
    %cst_31 = arith.constant 9.99999974E-6 : f32
    %76 = vector.broadcast %cst_31 : f32 to vector<8x1xf32>
    %77 = arith.addf %73, %76 : vector<8x1xf32>
    %78 = math.rsqrt %77 : vector<8x1xf32>
    %79 = vector.broadcast %78 : vector<8x1xf32> to vector<8x32xf32>
    %80 = arith.mulf %75, %79 : vector<8x32xf32>
    %81 = vector.broadcast %11 : vector<1x32xf32> to vector<8x32xf32>
    %82 = arith.mulf %80, %81 : vector<8x32xf32>
    %83 = vector.broadcast %12 : vector<1x32xf32> to vector<8x32xf32>
    %84 = arith.addf %82, %83 : vector<8x32xf32>
    %c0_32 = arith.constant 0 : index
    %c0_33 = arith.constant 0 : index
    %c0_34 = arith.constant 0 : index
    %85 = vector.load %arg10[%c0_32, %c0_33, %c0_34] : memref<2x8x32xf32, #tpu.memory_space<vmem>>, vector<1x8x32xf32>
    %86 = vector.shape_cast %85 : vector<1x8x32xf32> to vector<8x32xf32>
    %87 = vector.shape_cast %84 : vector<8x32xf32> to vector<1x8x32xf32>
    tpu.vector_store %arg10[%c0_32, %c0_33, %c0_34], %87 {strides = array<i32>} : memref<2x8x32xf32, #tpu.memory_space<vmem>>, vector<1x8x32xf32>,
    %cst_35 = arith.constant 2.500000e-01 : f32
    %88 = vector.broadcast %cst_35 : f32 to vector<8x16xf32>
    %89 = arith.mulf %59, %88 : vector<8x16xf32>
    %cst_36 = arith.constant 9.99999993E-9 : f32
    %90 = vector.broadcast %cst_36 : f32 to vector<8x16xf32>
    %91 = arith.addf %89, %90 : vector<8x16xf32>
    %92 = math.log %91 : vector<8x16xf32>
    %cst_37 = arith.constant dense<0.000000e+00> : vector<8xf32>
    %93 = vector.multi_reduction <add>, %92, %cst_37 [1] : vector<8x16xf32> to vector<8xf32>
    %94 = vector.shape_cast %93 : vector<8xf32> to vector<8x1xf32>
    %cst_38 = arith.constant dense<0.000000e+00> : vector<1xf32>
    %95 = vector.multi_reduction <add>, %94, %cst_38 [0] : vector<8x1xf32> to vector<1xf32>
    %96 = vector.shape_cast %95 : vector<1xf32> to vector<1x1xf32>
    %97 = arith.addf %13, %96 : vector<1x1xf32>
    %98 = vector.extract_strided_slice %6 {offsets = [16, 0], sizes = [16, 32], strides = [1, 1]} : vector<32x64xf32> to vector<16x32xf32>
    %99 = vector.extract_strided_slice %6 {offsets = [16, 32], sizes = [16, 32], strides = [1, 1]} : vector<32x64xf32> to vector<16x32xf32>
    %cst_39 = arith.constant dense<0.000000e+00> : vector<32x16xf32>
    %100 = tpu.matmul %7, %98, %cst_39 {dimension_numbers = #tpu.dot_dimension_numbers<[1], [1], [0], [0], [0, 0, 1, 0], [], []>} : vector<32x32xf32>, vector<16x32xf32>, vector<32x16xf32> -> vector<32x16xf32>
    %cst_40 = arith.constant 0.353553385 : f32
    %101 = vector.broadcast %cst_40 : f32 to vector<32x16xf32>
    %102 = arith.mulf %100, %101 : vector<32x16xf32>
    %cst_41 = arith.constant dense<0xFF800000> : vector<32xf32>
    %103 = vector.multi_reduction <maximumf>, %102, %cst_41 [1] : vector<32x16xf32> to vector<32xf32>
    %104 = vector.shape_cast %103 : vector<32xf32> to vector<32x1xf32>
    %105 = vector.broadcast %104 : vector<32x1xf32> to vector<32x16xf32>
    %106 = arith.subf %102, %105 : vector<32x16xf32>
    %107 = math.exp %106 : vector<32x16xf32>
    %cst_42 = arith.constant dense<0.000000e+00> : vector<32xf32>
    %108 = vector.multi_reduction <add>, %107, %cst_42 [1] : vector<32x16xf32> to vector<32xf32>
    %109 = vector.shape_cast %108 : vector<32xf32> to vector<32x1xf32>
    %110 = tpu.reciprocal %109 {approx = true} : vector<32x1xf32> -> vector<32x1xf32>
    %111 = vector.broadcast %110 : vector<32x1xf32> to vector<32x16xf32>
    %112 = arith.mulf %107, %111 : vector<32x16xf32>
    %cst_43 = arith.constant dense<0.000000e+00> : vector<32x32xf32>
    %113 = tpu.matmul %112, %99, %cst_43 {dimension_numbers = #tpu.dot_dimension_numbers<[1], [0], [0], [1], [0, 0, 1, 1], [], []>} : vector<32x16xf32>, vector<16x32xf32>, vector<32x32xf32> -> vector<32x32xf32>
    %cst_44 = arith.constant 0.000000e+00 : f32
    %114 = vector.broadcast %cst_44 : f32 to vector<8x32xf32>
    %cst_45 = arith.constant 0.000000e+00 : f32
    %115 = vector.broadcast %cst_45 : f32 to vector<8x16xf32>
    %116 = vector.extract_strided_slice %113 {offsets = [0, 0], sizes = [8, 32], strides = [1, 1]} : vector<32x32xf32> to vector<8x32xf32>
    %117 = vector.extract_strided_slice %8 {offsets = [0, 0], sizes = [1, 32], strides = [1, 1]} : vector<4x32xf32> to vector<1x32xf32>
    %118 = vector.broadcast %117 : vector<1x32xf32> to vector<8x32xf32>
    %119 = arith.mulf %116, %118 : vector<8x32xf32>
    %120 = arith.addf %114, %119 : vector<8x32xf32>
    %121 = vector.extract_strided_slice %112 {offsets = [0, 0], sizes = [8, 16], strides = [1, 1]} : vector<32x16xf32> to vector<8x16xf32>
    %122 = arith.addf %115, %121 : vector<8x16xf32>
    %123 = vector.extract_strided_slice %113 {offsets = [8, 0], sizes = [8, 32], strides = [1, 1]} : vector<32x32xf32> to vector<8x32xf32>
    %124 = vector.extract_strided_slice %8 {offsets = [1, 0], sizes = [1, 32], strides = [1, 1]} : vector<4x32xf32> to vector<1x32xf32>
    %125 = vector.broadcast %124 : vector<1x32xf32> to vector<8x32xf32>
    %126 = arith.mulf %123, %125 : vector<8x32xf32>
    %127 = arith.addf %120, %126 : vector<8x32xf32>
    %128 = vector.extract_strided_slice %112 {offsets = [8, 0], sizes = [8, 16], strides = [1, 1]} : vector<32x16xf32> to vector<8x16xf32>
    %129 = arith.addf %122, %128 : vector<8x16xf32>
    %130 = vector.extract_strided_slice %113 {offsets = [16, 0], sizes = [8, 32], strides = [1, 1]} : vector<32x32xf32> to vector<8x32xf32>
    %131 = vector.extract_strided_slice %8 {offsets = [2, 0], sizes = [1, 32], strides = [1, 1]} : vector<4x32xf32> to vector<1x32xf32>
    %132 = vector.broadcast %131 : vector<1x32xf32> to vector<8x32xf32>
    %133 = arith.mulf %130, %132 : vector<8x32xf32>
    %134 = arith.addf %127, %133 : vector<8x32xf32>
    %135 = vector.extract_strided_slice %112 {offsets = [16, 0], sizes = [8, 16], strides = [1, 1]} : vector<32x16xf32> to vector<8x16xf32>
    %136 = arith.addf %129, %135 : vector<8x16xf32>
    %137 = vector.extract_strided_slice %113 {offsets = [24, 0], sizes = [8, 32], strides = [1, 1]} : vector<32x32xf32> to vector<8x32xf32>
    %138 = vector.extract_strided_slice %8 {offsets = [3, 0], sizes = [1, 32], strides = [1, 1]} : vector<4x32xf32> to vector<1x32xf32>
    %139 = vector.broadcast %138 : vector<1x32xf32> to vector<8x32xf32>
    %140 = arith.mulf %137, %139 : vector<8x32xf32>
    %141 = arith.addf %134, %140 : vector<8x32xf32>
    %142 = vector.extract_strided_slice %112 {offsets = [24, 0], sizes = [8, 16], strides = [1, 1]} : vector<32x16xf32> to vector<8x16xf32>
    %143 = arith.addf %136, %142 : vector<8x16xf32>
    %cst_46 = arith.constant dense<0.000000e+00> : vector<8x32xf32>
    %144 = tpu.matmul %141, %9, %cst_46 {dimension_numbers = #tpu.dot_dimension_numbers<[1], [0], [0], [1], [0, 0, 1, 1], [], []>} : vector<8x32xf32>, vector<32x32xf32>, vector<8x32xf32> -> vector<8x32xf32>
    %145 = vector.broadcast %10 : vector<1x32xf32> to vector<8x32xf32>
    %146 = arith.addf %144, %145 : vector<8x32xf32>
    %cst_47 = arith.constant dense<0.000000e+00> : vector<8xf32>
    %147 = vector.multi_reduction <add>, %146, %cst_47 [1] : vector<8x32xf32> to vector<8xf32>
    %148 = vector.shape_cast %147 : vector<8xf32> to vector<8x1xf32>
    %cst_48 = arith.constant 3.200000e+01 : f32
    %149 = vector.broadcast %cst_48 : f32 to vector<8x1xf32>
    %150 = arith.divf %148, %149 : vector<8x1xf32>
    %151 = vector.broadcast %150 : vector<8x1xf32> to vector<8x32xf32>
    %152 = arith.subf %146, %151 : vector<8x32xf32>
    %153 = arith.mulf %152, %152 : vector<8x32xf32>
    %cst_49 = arith.constant dense<0.000000e+00> : vector<8xf32>
    %154 = vector.multi_reduction <add>, %153, %cst_49 [1] : vector<8x32xf32> to vector<8xf32>
    %155 = vector.shape_cast %154 : vector<8xf32> to vector<8x1xf32>
    %cst_50 = arith.constant 3.200000e+01 : f32
    %156 = vector.broadcast %cst_50 : f32 to vector<8x1xf32>
    %157 = arith.divf %155, %156 : vector<8x1xf32>
    %158 = vector.broadcast %150 : vector<8x1xf32> to vector<8x32xf32>
    %159 = arith.subf %146, %158 : vector<8x32xf32>
    %cst_51 = arith.constant 9.99999974E-6 : f32
    %160 = vector.broadcast %cst_51 : f32 to vector<8x1xf32>
    %161 = arith.addf %157, %160 : vector<8x1xf32>
    %162 = math.rsqrt %161 : vector<8x1xf32>
    %163 = vector.broadcast %162 : vector<8x1xf32> to vector<8x32xf32>
    %164 = arith.mulf %159, %163 : vector<8x32xf32>
    %165 = vector.broadcast %11 : vector<1x32xf32> to vector<8x32xf32>
    %166 = arith.mulf %164, %165 : vector<8x32xf32>
    %167 = vector.broadcast %12 : vector<1x32xf32> to vector<8x32xf32>
    %168 = arith.addf %166, %167 : vector<8x32xf32>
    %c1 = arith.constant 1 : index
    %c0_52 = arith.constant 0 : index
    %c0_53 = arith.constant 0 : index
    %169 = vector.load %arg10[%c1, %c0_52, %c0_53] : memref<2x8x32xf32, #tpu.memory_space<vmem>>, vector<1x8x32xf32>
    %170 = vector.shape_cast %169 : vector<1x8x32xf32> to vector<8x32xf32>
    %171 = vector.shape_cast %168 : vector<8x32xf32> to vector<1x8x32xf32>
    tpu.vector_store %arg10[%c1, %c0_52, %c0_53], %171 {strides = array<i32>} : memref<2x8x32xf32, #tpu.memory_space<vmem>>, vector<1x8x32xf32>,
    %cst_54 = arith.constant 2.500000e-01 : f32
    %172 = vector.broadcast %cst_54 : f32 to vector<8x16xf32>
    %173 = arith.mulf %143, %172 : vector<8x16xf32>
    %cst_55 = arith.constant 9.99999993E-9 : f32
    %174 = vector.broadcast %cst_55 : f32 to vector<8x16xf32>
    %175 = arith.addf %173, %174 : vector<8x16xf32>
    %176 = math.log %175 : vector<8x16xf32>
    %cst_56 = arith.constant dense<0.000000e+00> : vector<8xf32>
    %177 = vector.multi_reduction <add>, %176, %cst_56 [1] : vector<8x16xf32> to vector<8xf32>
    %178 = vector.shape_cast %177 : vector<8xf32> to vector<8x1xf32>
    %cst_57 = arith.constant dense<0.000000e+00> : vector<1xf32>
    %179 = vector.multi_reduction <add>, %178, %cst_57 [0] : vector<8x1xf32> to vector<1xf32>
    %180 = vector.shape_cast %179 : vector<1xf32> to vector<1x1xf32>
    %181 = arith.addf %97, %180 : vector<1x1xf32>
    %c0_58 = arith.constant 0 : index
    %c0_59 = arith.constant 0 : index
    %c0_60 = arith.constant 0 : index
    %182 = vector.load %arg11[%c0_58, %c0_59, %c0_60] : memref<1x1x1xf32, #tpu.memory_space<vmem>>, vector<1x1x1xf32>
    %183 = vector.shape_cast %182 : vector<1x1x1xf32> to vector<1x1xf32>
    %184 = vector.shape_cast %181 : vector<1x1xf32> to vector<1x1x1xf32>
    tpu.vector_store %arg11[%c0_58, %c0_59, %c0_60], %184 {strides = array<i32>} : memref<1x1x1xf32, #tpu.memory_space<vmem>>, vector<1x1x1xf32>,
    return
  }
  func.func @transform_0(%arg0: i32) -> (i32, i32, i32) {
    %c0_i32 = arith.constant 0 : i32
    %c0_i32_0 = arith.constant 0 : i32
    %c0_i32_1 = arith.constant 0 : i32
    return %arg0, %c0_i32, %c0_i32_0 : i32, i32, i32
  }
  func.func @transform_1(%arg0: i32) -> (i32, i32) {
    %c0_i32 = arith.constant 0 : i32
    %c0_i32_0 = arith.constant 0 : i32
    %c0_i32_1 = arith.constant 0 : i32
    return %c0_i32, %c0_i32_0 : i32, i32
  }
  func.func @transform_2(%arg0: i32) -> (i32, i32) {
    %c0_i32 = arith.constant 0 : i32
    %c0_i32_0 = arith.constant 0 : i32
    %c0_i32_1 = arith.constant 0 : i32
    return %c0_i32, %c0_i32_0 : i32, i32
  }
  func.func @transform_3(%arg0: i32) -> (i32, i32) {
    %c0_i32 = arith.constant 0 : i32
    %c0_i32_0 = arith.constant 0 : i32
    %c0_i32_1 = arith.constant 0 : i32
    return %c0_i32, %c0_i32_0 : i32, i32
  }
  func.func @transform_4(%arg0: i32) -> (i32, i32) {
    %c0_i32 = arith.constant 0 : i32
    %c0_i32_0 = arith.constant 0 : i32
    %c0_i32_1 = arith.constant 0 : i32
    return %c0_i32, %c0_i32_0 : i32, i32
  }
  func.func @transform_5(%arg0: i32) -> (i32, i32) {
    %c0_i32 = arith.constant 0 : i32
    %c0_i32_0 = arith.constant 0 : i32
    %c0_i32_1 = arith.constant 0 : i32
    return %c0_i32, %c0_i32_0 : i32, i32
  }
  func.func @transform_6(%arg0: i32) -> (i32, i32) {
    %c0_i32 = arith.constant 0 : i32
    %c0_i32_0 = arith.constant 0 : i32
    %c0_i32_1 = arith.constant 0 : i32
    return %c0_i32, %c0_i32_0 : i32, i32
  }
  func.func @transform_7(%arg0: i32) -> (i32, i32) {
    %c0_i32 = arith.constant 0 : i32
    %c0_i32_0 = arith.constant 0 : i32
    %c0_i32_1 = arith.constant 0 : i32
    return %c0_i32, %c0_i32_0 : i32, i32
  }
  func.func @transform_8(%arg0: i32) -> (i32, i32) {
    %c0_i32 = arith.constant 0 : i32
    %c0_i32_0 = arith.constant 0 : i32
    %c0_i32_1 = arith.constant 0 : i32
    return %c0_i32, %c0_i32_0 : i32, i32
  }
  func.func @transform_9(%arg0: i32) -> (i32, i32, i32) {
    %c0_i32 = arith.constant 0 : i32
    %c0_i32_0 = arith.constant 0 : i32
    %c0_i32_1 = arith.constant 0 : i32
    return %arg0, %c0_i32, %c0_i32_0 : i32, i32, i32
  }
  func.func @transform_10(%arg0: i32) -> (i32, i32, i32) {
    %c0_i32 = arith.constant 0 : i32
    %c0_i32_0 = arith.constant 0 : i32
    %c0_i32_1 = arith.constant 0 : i32
    return %arg0, %c0_i32, %c0_i32_0 : i32, i32, i32
  }
}

</mosaic_0001>

<bundles_post_ra>
// kernel: learned_downsampler.1
= control target key start
LH: loop header
LB: loop body
LE: loop exit
PB: predicated region body
PF: predicated region fallthrough
CT: control target
= control target key end

     0   :  { %16 = vsyncpa [#allocation3], 0  ;;  %vm51_vm0 = vcmask 261120   ;;  %s1468_s0 = inlined_call_operand.vmem [shape: f32[2,16,32], index: 0, kind: input, shape index: {}]   ;;  %s1469_s1 = inlined_call_operand.vmem [shape: f32[32,32], index: 1, kind: input, shape index: {}]   ;;  %s1470_s2 = inlined_call_operand.vmem [shape: f32[4,32], index: 2, kind: input, shape index: {}]   ;;  %s1471_s3 = inlined_call_operand.vmem [shape: f32[32,64], index: 3, kind: input, shape index: {}]   ;;  %s1472_s4 = inlined_call_operand.vmem [shape: f32[1,64], index: 4, kind: input, shape index: {}]   ;;  %s1473_s5 = inlined_call_operand.vmem [shape: f32[32,32], index: 5, kind: input, shape index: {}]   ;;  %s1474_s6 = inlined_call_operand.vmem [shape: f32[1,32], index: 6, kind: input, shape index: {}]   ;;  %s1475_s7 = inlined_call_operand.vmem [shape: f32[1,32], index: 7, kind: input, shape index: {}]   ;;  %s1476_s8 = inlined_call_operand.vmem [shape: f32[1,32], index: 8, kind: input, shape index: {}]   ;;  %s1477_s9 = inlined_call_operand.hbm [shape: f32[2,8,32], index: 9, kind: output, shape index: {0}]   ;;  %s1478_s10 = inlined_call_operand.hbm [shape: f32[1,1,1], index: 10, kind: output, shape index: {1}]  }
   0x1   :  { %v43_v0 = vld [vmem:[%s1471_s3 + $0x18] sm:$0xff]  ;;  %v42_v1 = vld [vmem:[%s1471_s3 + $0x10] sm:$0xff]  ;;  %v36_v2 = vld [vmem:[%s1468_s0] sm:$0xff] }
   0x2   :  { %1028 = vmatprep.subr.mxu0 %v43_v0  ;;  %v41_v3 = vld [vmem:[%s1471_s3 + $0x8] sm:$0xff]  ;;  %1036 = vmatprep.mubr.msk.f32.mxu0 %vm51_vm0, %v36_v2 }
   0x3   :  { %1029 = vmatpush3.msra.mxu0 %v43_v0 }
   0x4   :  { %17 = vsyncpa [#allocation5], 0  ;;  %1030 = vmatprep.subr.mxu0 %v42_v1  ;;  %v40_v4 = vld [vmem:[%s1471_s3] sm:$0xff]  ;;  %v37_v5 = vld [vmem:[%s1468_s0 + $0x8] sm:$0xff]  ;;  %vm268_vm1 = vcmask 130048   ;;  %vm1197_vm2 = vmmov 0  }
   0x5   :  { %1031 = vmatpush3.msra.mxu0 %v42_v1  ;;  %v1280_v6 = vld [vmem:[%s1469_s1] sm:$0xff]  ;;  %v1302_v12 = vld [vmem:[%s1469_s1 + $0x8] sm:$0xff]  ;;  %v1307_v13 = vld [vmem:[%s1469_s1 + $0x10] sm:$0xff]  ;;  %vm924_vm3 = vcmask 0   ;;  %s1199_s28 = smov [#allocation2]  }
   0x6   :  { %1032 = vmatprep.subr.mxu0 %v41_v3  ;;  %1046 = vmatprep.mubr.msk.f32.mxu1 %vm51_vm0, %v1280_v6  ;;  %v1287_v7 = vld [vmem:[%s1472_s4] ss:$0 sm:$0xff]  ;;  %v1316_v14 = vld [vmem:[%s1469_s1 + $0x18] sm:$0xff]  ;;  %v38_v15 = vld [vmem:[%s1468_s0 + $0x10] sm:$0xff]  ;;  %s931_s4 = sshll.u32 %s1199_s28, 4  ;;  %s932_s4 = int_to_ptr.vmem [resolvable:$true] %s931_s4 }
   0x7   :  { %1033 = vmatpush3.msra.mxu0 %v41_v3  ;;  %v39_v16 = vld [vmem:[%s1468_s0 + $0x18] sm:$0xff]  ;;  %s1195_s0 = smov 96  }
   0x8   :  { %1034 = vmatprep.subr.mxu0 %v40_v4 }
   0x9   :  { %1035 = vmatpush3.msra.mxu0 %v40_v4 }
   0xa   :  { %1037 = vmatmul.mubr.msk.f32.vlgmr.msra.gmra.mxu0 %vm51_vm0, %v37_v5 }
   0xb   :  { %1039 = vmatprep.mubr.msk.f32.mxu0 %vm51_vm0, %v38_v15  ;;  %v153_v15 = vld [vmem:[%s1470_s2] sm:$0xf] }
   0xe   :  { %1040 = vmatmul.mubr.msk.f32.gmra.mxu0 %vm51_vm0, %v39_v16 }
  0xca   :  { %v1038_v8 = vpop.f32.mrf.mxu0 }
  0xcb   :  { %v1290_v9 = vadd.f32 %v1038_v8, %v1287_v7  ;;  %v1371_v8 = vld [vmem:[%s1473_s5 + $0x18] sm:$0xff] }
  0xcc   :  { %v130_v10 = vpop.f32.mrf.mxu0 }
  0xcd   :  { %v131_v11 = vadd.f32 %v1287_v7, %v130_v10  ;;  %1042 = vmatprep.subr.msk.mxu1 %vm51_vm0, %v1290_v9  ;;  %v1391_v10 = vld [vmem:[%s1473_s5] sm:$0xff] }
  0xce   :  { %1043 = vmatpush3.xpose.msk.msra.mxu1 %vm51_vm0, %v1290_v9  ;;  %v1041_v53 = vpop.f32.mrf.mxu0 }
  0xcf   :  { %1044 = vmatprep.subr.msk.mxu1 %vm51_vm0, %v131_v11  ;;  %v1340_v55 = vadd.f32 %v1041_v53, %v1287_v7 }
  0xd0   :  { %v140_v59 = vpop.f32.mrf.mxu0 }
  0xd1   :  { %v1346_v62 = vadd.f32 %v1287_v7, %v140_v59  ;;  %v1196_v7 = vmov 0.0  }
  0xd2   :  { %1045 = vmatpush3.xpose.msk.msra.mxu1 %vm51_vm0, %v131_v11 }
  0xd3   :  { %1062 = vmatprep.subr.mxu1 %v1196_v7 }
  0xd5   :  { %1047 = vmatmul.mubr.msk.f32.vlgmr.msra.gmra.mxu1 %vm51_vm0, %v1302_v12 }
  0xd6   :  { %1049 = vmatprep.mubr.msk.f32.mxu1 %vm51_vm0, %v1307_v13  ;;  %1063 = vmatpush3.msra.mxu1 %v1371_v8 }
  0xd7   :  { %1064 = vmatprep.subr.mxu1 %v1196_v7 }
  0xd9   :  { %1050 = vmatmul.mubr.msk.f32.gmra.mxu1 %vm51_vm0, %v1316_v14 }
  0xda   :  { %1070 = vmatprep.mubr.msk.f32.mxu1 %vm1197_vm2, %v1196_v7 }
 0x195   :  { %v1048_v17 = vpop.f32.mrf.mxu1 }
 0x196   :  { %v265_v21 = vmul.f32 0.35355338, %v1048_v17 }
 0x197   :  { %v245_v18 = vpop.f32.mrf.mxu1 }
 0x198   :  { %v264_v19 = vmul.f32 0.35355338, %v245_v18  ;;  %v272_v26 = vsel %vm268_vm1, %v265_v21, -inf }
 0x199   :  { %v1051_v20 = vpop.f32.mrf.mxu1 }
 0x19a   :  { %v269_v22 = vsel %vm268_vm1, %v264_v19, -inf  ;;  %v267_v25 = vmul.f32 0.35355338, %v1051_v20 }
 0x19b   :  { %270 = vmax.xlane.f32.xlu0 %v269_v22  ;;  %v255_v23 = vpop.f32.mrf.mxu1 }
 0x19c   :  { %v266_v24 = vmul.f32 0.35355338, %v255_v23  ;;  %v278_v28 = vsel %vm268_vm1, %v267_v25, -inf }
 0x19e   :  { %v275_v27 = vsel %vm268_vm1, %v266_v24, -inf }
 0x19f   :  { %273 = vmax.xlane.f32.xlu0 %v272_v26  ;;  %276 = vmax.xlane.f32.xlu1 %v275_v27 }
 0x1a3   :  { %279 = vmax.xlane.f32.xlu1 %v278_v28 }
 0x224   :  { %v271_v29 = vpop.xlane.xlu0 %270 }
 0x225   :  { %v281_v30 = vsub.f32 %v264_v19, %v271_v29 }
 0x227   :  { %v285_v31 = vmul.f32 1.442695, %v281_v30 }
 0x228   :  { %v274_v32 = vpop.xlane.xlu0 %273  ;;  %v277_v33 = vpop.xlane.xlu1 %276 }
 0x229   :  { %1111 = vpow2.f32 %v285_v31  ;;  %v282_v34 = vsub.f32 %v265_v21, %v274_v32  ;;  %v283_v35 = vsub.f32 %v266_v24, %v277_v33 }
 0x22b   :  { %v287_v36 = vmul.f32 1.442695, %v282_v34  ;;  %v289_v37 = vmul.f32 1.442695, %v283_v35 }
 0x22c   :  { %v280_v38 = vpop.xlane.xlu1 %279 }
 0x22d   :  { %1113 = vpow2.f32 %v287_v36  ;;  %v284_v39 = vsub.f32 %v267_v25, %v280_v38 }
 0x22e   :  { %1115 = vpow2.f32 %v289_v37 }
 0x22f   :  { %v291_v40 = vmul.f32 1.442695, %v284_v39 }
 0x231   :  { %1117 = vpow2.f32 %v291_v40 }
 0x236   :  { %v1112_v41 = vpop.eup %1111 }
 0x237   :  { %v293_v42 = vsel %vm268_vm1, %v1112_v41, 0.0 }
 0x238   :  { %294 = vadd.xlane.f32.xlu0 %v293_v42 }
 0x23a   :  { %v1114_v43 = vpop.eup %1113 }
 0x23b   :  { %v1116_v44 = vpop.eup %1115  ;;  %v296_v45 = vsel %vm268_vm1, %v1114_v43, 0.0 }
 0x23c   :  { %297 = vadd.xlane.f32.xlu1 %v296_v45  ;;  %v299_v46 = vsel %vm268_vm1, %v1116_v44, 0.0 }
 0x23d   :  { %300 = vadd.xlane.f32.xlu0 %v299_v46 }
 0x23e   :  { %v1118_v47 = vpop.eup %1117 }
 0x23f   :  { %v302_v48 = vsel %vm268_vm1, %v1118_v47, 0.0 }
 0x240   :  { %303 = vadd.xlane.f32.xlu1 %v302_v48 }
 0x251   :  { %313 = vrot.lane.b32.xlu1 %v131_v11, %s1195_s0  ;;  %v416_v11 = vlaneseq }
 0x253   :  { %315 = vrot.lane.b32.xlu0 %v1290_v9, %s1195_s0  ;;  %v1385_v9 = vld [vmem:[%s1473_s5 + $0x8] sm:$0xff] }
 0x2c1   :  { %v295_v49 = vpop.xlane.xlu0 %294 }
 0x2c2   :  { %1119 = vrcp.f32 %v295_v49 }
 0x2c5   :  { %v298_v50 = vpop.xlane.xlu1 %297 }
 0x2c6   :  { %v301_v51 = vpop.xlane.xlu0 %300  ;;  %1121 = vrcp.f32 %v298_v50 }
 0x2c7   :  { %1123 = vrcp.f32 %v301_v51 }
 0x2c9   :  { %v304_v52 = vpop.xlane.xlu1 %303 }
 0x2ca   :  { %v316_v54 = vpop.permute.xlu0 %315  ;;  %1125 = vrcp.f32 %v304_v52 }
 0x2cb   :  { %1052 = vmatprep.subr.mxu0 %v316_v54 }
 0x2cc   :  { %1053 = vmatpush3.msra.mxu0 %v316_v54 }
 0x2cd   :  { %v314_v56 = vpop.permute.xlu1 %313 }
 0x2ce   :  { %1054 = vmatprep.subr.mxu0 %v314_v56 }
 0x2cf   :  { %v1120_v57 = vpop.eup %1119  ;;  %1055 = vmatpush3.msra.mxu0 %v314_v56 }
 0x2d0   :  { %v309_v58 = vmul.f32 %v1120_v57, %v1112_v41  ;;  %1073 = vmatprep.subr.msk.mxu0 %vm51_vm0, %v1340_v55 }
 0x2d2   :  { %1056 = vmatprep.mubr.msk.f32.mxu0 %vm268_vm1, %v309_v58 }
 0x2d3   :  { %v1122_v60 = vpop.eup %1121 }
 0x2d4   :  { %v1124_v61 = vpop.eup %1123  ;;  %v310_v63 = vmul.f32 %v1122_v60, %v1114_v43 }
 0x2d5   :  { %v311_v0 = vmul.f32 %v1124_v61, %v1116_v44 }
 0x2d6   :  { %v429_v1 = vadd.f32 %v310_v63, %v309_v58  ;;  %1057 = vmatmul.mubr.msk.f32.vlgmr.msra.gmra.mxu0 %vm268_vm1, %v310_v63 }
 0x2d7   :  { %v1126_v2 = vpop.eup %1125  ;;  %1074 = vmatpush3.xpose.msk.msra.mxu0 %vm51_vm0, %v1340_v55  ;;  %1059 = vmatprep.mubr.msk.f32.mxu0 %vm268_vm1, %v311_v0 }
 0x2d8   :  { %1075 = vmatprep.subr.msk.mxu0 %vm51_vm0, %v1346_v62  ;;  %v312_v3 = vmul.f32 %v1126_v2, %v1118_v47  ;;  %v436_v4 = vadd.f32 %v429_v1, %v311_v0 }
 0x2da   :  { %1060 = vmatmul.mubr.msk.f32.gmra.mxu0 %vm268_vm1, %v312_v3  ;;  %v1355_v5 = vadd.f32 %v436_v4, %v312_v3 }
 0x2db   :  { %1076 = vmatpush3.xpose.msk.msra.mxu0 %vm51_vm0, %v1346_v62  ;;  %1077 = vmatprep.mubr.msk.f32.mxu0 %vm51_vm0, %v1280_v6  ;;  %v1378_v6 = vld [vmem:[%s1473_s5 + $0x10] sm:$0xff] }
 0x2dc   :  { %1065 = vmatpush3.msra.mxu1 %v1378_v6 }
 0x2dd   :  { %1066 = vmatprep.subr.mxu1 %v1196_v7 }
 0x2de   :  { %1078 = vmatmul.mubr.msk.f32.vlgmr.msra.gmra.mxu0 %vm51_vm0, %v1302_v12  ;;  %1067 = vmatpush3.msra.mxu1 %v1385_v9  ;;  %v417_v12 = vshrl.u32 %v416_v11, 7  ;;  %v971_v11 = vld [vmem:[%s1474_s6] ss:$0 sm:$0xff] }
 0x2df   :  { %1080 = vmatprep.mubr.msk.f32.mxu0 %vm51_vm0, %v1307_v13  ;;  %1068 = vmatprep.subr.mxu1 %v1196_v7 }
 0x2e0   :  { %1069 = vmatpush3.msra.mxu1 %v1391_v10  ;;  %v418_v13 = vsub.s32 0, %v417_v12  ;;  %v432_v17 = vsub.s32 2, %v417_v12  ;;  %v439_v20 = vsub.s32 3, %v417_v12 }
 0x2e2   :  { %1081 = vmatmul.mubr.msk.f32.gmra.mxu0 %vm51_vm0, %v1316_v14  ;;  %v425_v14 = vsub.s32 1, %v417_v12  ;;  %v1400_v16 = vrot.slane %v153_v15, %v418_v13  ;;  %v1405_v23 = vrot.slane %v153_v15, %v432_v17  ;;  %v1408_v26 = vrot.slane %v153_v15, %v439_v20 }
 0x2e4   :  { %v1402_v19 = vrot.slane %v153_v15, %v425_v14 }
 0x396   :  { %v1058_v18 = vpop.f32.mrf.mxu0 }
 0x397   :  { %v427_v25 = vmul.f32 %v1058_v18, %v1402_v19 }
 0x398   :  { %v397_v21 = vpop.f32.mrf.mxu0 }
 0x399   :  { %v420_v22 = vmul.f32 %v1400_v16, %v397_v21 }
 0x39a   :  { %v1061_v24 = vpop.f32.mrf.mxu0 }
 0x39b   :  { %v428_v28 = vadd.f32 %v427_v25, %v420_v22  ;;  %v441_v31 = vmul.f32 %v1061_v24, %v1408_v26 }
 0x39c   :  { %v407_v27 = vpop.f32.mrf.mxu0 }
 0x39d   :  { %v434_v29 = vmul.f32 %v1405_v23, %v407_v27 }
 0x39e   :  { %v1079_v30 = vpop.f32.mrf.mxu0 }
 0x39f   :  { %v435_v32 = vadd.f32 %v434_v29, %v428_v28  ;;  %v658_v33 = vmul.f32 0.35355338, %v1079_v30 }
 0x3a0   :  { %v638_v34 = vpop.f32.mrf.mxu0 }
 0x3a1   :  { %v442_v35 = vadd.f32 %v441_v31, %v435_v32  ;;  %v657_v36 = vmul.f32 0.35355338, %v638_v34  ;;  %v664_v37 = vsel %vm268_vm1, %v658_v33, -inf }
 0x3a2   :  { %665 = vmax.xlane.f32.xlu0 %v664_v37  ;;  %v1082_v38 = vpop.f32.mrf.mxu0 }
 0x3a3   :  { %v660_v39 = vmul.f32 0.35355338, %v1082_v38  ;;  %1071 = vmatmul.mubr.msk.f32.vlgmr.msra.gmra.mxu1 %vm51_vm0, %v442_v35  ;;  %v661_v40 = vsel %vm268_vm1, %v657_v36, -inf }
 0x3a4   :  { %662 = vmax.xlane.f32.xlu1 %v661_v40  ;;  %v648_v41 = vpop.f32.mrf.mxu0 }
 0x3a5   :  { %v659_v42 = vmul.f32 0.35355338, %v648_v41  ;;  %v670_v43 = vsel %vm268_vm1, %v660_v39, -inf }
 0x3a7   :  { %v667_v44 = vsel %vm268_vm1, %v659_v42, -inf }
 0x3a8   :  { %671 = vmax.xlane.f32.xlu1 %v670_v43  ;;  %668 = vmax.xlane.f32.xlu0 %v667_v44 }
 0x42b   :  { %v666_v45 = vpop.xlane.xlu0 %665 }
 0x42c   :  { %v674_v46 = vsub.f32 %v658_v33, %v666_v45 }
 0x42d   :  { %v663_v47 = vpop.xlane.xlu1 %662 }
 0x42e   :  { %v679_v48 = vmul.f32 1.442695, %v674_v46  ;;  %v673_v49 = vsub.f32 %v657_v36, %v663_v47 }
 0x430   :  { %1127 = vpow2.f32 %v679_v48  ;;  %v677_v50 = vmul.f32 1.442695, %v673_v49 }
 0x431   :  { %v672_v51 = vpop.xlane.xlu1 %671  ;;  %v669_v52 = vpop.xlane.xlu0 %668 }
 0x432   :  { %1129 = vpow2.f32 %v677_v50  ;;  %v676_v53 = vsub.f32 %v660_v39, %v672_v51  ;;  %v675_v54 = vsub.f32 %v659_v42, %v669_v52 }
 0x434   :  { %v683_v56 = vmul.f32 1.442695, %v676_v53  ;;  %v681_v57 = vmul.f32 1.442695, %v675_v54 }
 0x436   :  { %1131 = vpow2.f32 %v683_v56 }
 0x437   :  { %1133 = vpow2.f32 %v681_v57 }
 0x43d   :  { %v1128_v58 = vpop.eup %1127 }
 0x43e   :  { %v688_v59 = vsel %vm268_vm1, %v1128_v58, 0.0 }
 0x43f   :  { %v1130_v60 = vpop.eup %1129  ;;  %689 = vadd.xlane.f32.xlu1 %v688_v59 }
 0x440   :  { %v685_v61 = vsel %vm268_vm1, %v1130_v60, 0.0 }
 0x441   :  { %686 = vadd.xlane.f32.xlu0 %v685_v61 }
 0x443   :  { %v1132_v63 = vpop.eup %1131 }
 0x444   :  { %v1134_v0 = vpop.eup %1133  ;;  %v694_v1 = vsel %vm268_vm1, %v1132_v63, 0.0 }
 0x445   :  { %695 = vadd.xlane.f32.xlu1 %v694_v1  ;;  %v691_v2 = vsel %vm268_vm1, %v1134_v0, 0.0 }
 0x446   :  { %692 = vadd.xlane.f32.xlu0 %v691_v2  ;;  %v974_v2 = vld [vmem:[%s1476_s8] ss:$0 sm:$0xff] }
 0x456   :  { %705 = vrot.lane.b32.xlu1 %v1346_v62, %s1195_s0 }
 0x45c   :  { %707 = vrot.lane.b32.xlu0 %v1340_v55, %s1195_s0 }
 0x463   :  { %v519_v3 = vpop.f32.mrf.mxu1 }
 0x464   :  { %v520_v12 = vadd.f32 %v971_v11, %v519_v3 }
 0x465   :  { %v1072_v4 = vpop.f32.mrf.mxu1 }
 0x466   :  { %v523_v13 = vsel %vm51_vm0, %v520_v12, 0.0 }
 0x47a   :  { %524 = vadd.xlane.f32.xlu1 %v523_v13 }
 0x4c8   :  { %v690_v14 = vpop.xlane.xlu1 %689 }
 0x4c9   :  { %1135 = vrcp.f32 %v690_v14 }
 0x4ca   :  { %v687_v15 = vpop.xlane.xlu0 %686 }
 0x4cb   :  { %1137 = vrcp.f32 %v687_v15 }
 0x4ce   :  { %v696_v17 = vpop.xlane.xlu1 %695 }
 0x4cf   :  { %1139 = vrcp.f32 %v696_v17  ;;  %v693_v62 = vpop.xlane.xlu0 %692 }
 0x4d0   :  { %1141 = vrcp.f32 %v693_v62 }
 0x4d2   :  { %v706_v55 = vpop.permute.xlu1 %705 }
 0x4d3   :  { %v708_v18 = vpop.permute.xlu0 %707 }
 0x4d4   :  { %1083 = vmatprep.subr.mxu1 %v708_v18 }
 0x4d5   :  { %1084 = vmatpush3.msra.mxu1 %v708_v18 }
 0x4d6   :  { %v1136_v20 = vpop.eup %1135  ;;  %1085 = vmatprep.subr.mxu1 %v706_v55 }
 0x4d7   :  { %1086 = vmatpush3.msra.mxu1 %v706_v55  ;;  %v702_v24 = vmul.f32 %v1136_v20, %v1128_v58 }
 0x4d8   :  { %v1138_v21 = vpop.eup %1137  ;;  %1093 = vmatprep.subr.mxu1 %v1196_v7 }
 0x4d9   :  { %v701_v22 = vmul.f32 %v1138_v21, %v1130_v60 }
 0x4db   :  { %1087 = vmatprep.mubr.msk.f32.mxu1 %vm268_vm1, %v701_v22  ;;  %v813_v25 = vadd.f32 %v702_v24, %v701_v22 }
 0x4dc   :  { %v1140_v27 = vpop.eup %1139  ;;  %1088 = vmatmul.mubr.msk.f32.vlgmr.msra.gmra.mxu1 %vm268_vm1, %v702_v24 }
 0x4dd   :  { %v1142_v28 = vpop.eup %1141  ;;  %v704_v29 = vmul.f32 %v1140_v27, %v1132_v63  ;;  %1094 = vmatpush3.msra.mxu1 %v1371_v8 }
 0x4de   :  { %v703_v30 = vmul.f32 %v1142_v28, %v1134_v0  ;;  %1095 = vmatprep.subr.mxu1 %v1196_v7  ;;  %v973_v0 = vld [vmem:[%s1475_s7] ss:$0 sm:$0xff]  ;;  %s1198_s7 = smov [#allocation4]  }
 0x4df   :  { %1096 = vmatpush3.msra.mxu1 %v1378_v6  ;;  %s944_s8 = sshll.u32 %s1198_s7, 4  ;;  %s945_s8 = int_to_ptr.vmem [resolvable:$true] %s944_s8 }
 0x4e0   :  { %1090 = vmatprep.mubr.msk.f32.mxu1 %vm268_vm1, %v703_v30  ;;  %1097 = vmatprep.subr.mxu1 %v1196_v7  ;;  %v816_v31 = vadd.f32 %v813_v25, %v703_v30  ;;  %s1151_s29 = scalar_lea.vmem %s945_s8, 16  ;;  %s1155_s30 = scalar_lea.vmem %s945_s8, 32 }
 0x4e1   :  { %1091 = vmatmul.mubr.msk.f32.gmra.mxu1 %vm268_vm1, %v704_v29  ;;  %p1152_p0 = scmp.ne.s32.totalorder %s945_s8, %s1151_s29  ;;  %p1156_p1 = scmp.lt.s32.totalorder %s945_s8, %s945_s8 }
 0x4e2   :  { %1098 = vmatpush3.msra.mxu1 %v1385_v9  ;;  %1101 = vmatprep.mubr.msk.f32.mxu1 %vm1197_vm2, %v1196_v7  ;;  %v819_v32 = vadd.f32 %v816_v31, %v704_v29  ;;  %p1157_p2 = scmp.lt.s32.totalorder %s1155_s30, %s1151_s29 }
 0x4e3   :  { %1099 = vmatprep.subr.mxu1 %v1196_v7  ;;  %v552_v7 = vmul.f32 0.25, %v1355_v5 }
 0x4e4   :  { %1100 = vmatpush3.msra.mxu1 %v1391_v10  ;;  %v910_v5 = vmul.f32 0.25, %v819_v32  ;;  %p1158_p3 = por %p1157_p2, %p1156_p1 }
 0x4e5   :  { %v553_v10 = vadd.f32 1e-08, %v552_v7 }
 0x4e6   :  { %v911_v49 = vadd.f32 1e-08, %v910_v5  ;;  %p1159_p4 = pnand %p1158_p3, %p1152_p0 }
 0x4e7   :  { %1143 = vlog2.f32 %v553_v10 }
 0x4e8   :  { %1145 = vlog2.f32 %v911_v49 }
 0x503   :  { %v525_v41 = vpop.xlane.xlu1 %524 }
 0x504   :  { %v527_v42 = vmul.f32 0.03125, %v525_v41 }
 0x59c   :  { %v1089_v8 = vpop.f32.mrf.mxu1 }
 0x59d   :  { %v811_v35 = vmul.f32 %v1089_v8, %v1402_v19 }
 0x59e   :  { %v789_v33 = vpop.f32.mrf.mxu1 }
 0x59f   :  { %v808_v6 = vmul.f32 %v789_v33, %v1400_v16  ;;  %v528_v16 = vsub.f32 %v520_v12, %v527_v42 }
 0x5a1   :  { %v1092_v34 = vpop.f32.mrf.mxu1  ;;  %v812_v37 = vadd.f32 %v811_v35, %v808_v6  ;;  %v529_v46 = vmul.f32 %v528_v16, %v528_v16 }
 0x5a2   :  { %v817_v9 = vmul.f32 %v1092_v34, %v1408_v26 }
 0x5a3   :  { %v799_v36 = vpop.f32.mrf.mxu1  ;;  %v530_v26 = vsel %vm51_vm0, %v529_v46, 0.0 }
 0x5a4   :  { %v814_v38 = vmul.f32 %v799_v36, %v1405_v23  ;;  %v1144_v23 = vpop.eup %1143 }
 0x5a5   :  { %v555_v47 = vmul.f32 0.6931472, %v1144_v23  ;;  %v1146_v53 = vpop.eup %1145 }
 0x5a6   :  { %v815_v39 = vadd.f32 %v814_v38, %v812_v37  ;;  %v913_v60 = vmul.f32 0.6931472, %v1146_v53 }
 0x5a7   :  { %v556_v48 = vsel %vm268_vm1, %v555_v47, 0.0 }
 0x5a8   :  { %v818_v40 = vadd.f32 %v817_v9, %v815_v39  ;;  %v914_v61 = vsel %vm268_vm1, %v913_v60, 0.0 }
 0x5aa   :  { %1102 = vmatmul.mubr.msk.f32.vlgmr.msra.gmra.mxu1 %vm51_vm0, %v818_v40 }
 0x66a   :  { %v889_v43 = vpop.f32.mrf.mxu1 }
 0x66b   :  { %v890_v44 = vadd.f32 %v971_v11, %v889_v43 }
 0x66c   :  { %v1103_v19 = vpop.f32.mrf.mxu1 }
 0x66d   :  { %v893_v45 = vsel %vm51_vm0, %v890_v44, 0.0 }
 0x66e   :  { %894 = vadd.xlane.f32.xlu0 %v893_v45 }
 0x672   :  { %531 = vadd.xlane.f32.xlu0 %v530_v26 }
 0x676   :  { %557 = vadd.xlane.f32.xlu0 %v556_v48 }
 0x6f7   :  { %v895_v50 = vpop.xlane.xlu0 %894 }
 0x6f8   :  { %v896_v51 = vmul.f32 0.03125, %v895_v50 }
 0x6fa   :  { %v897_v52 = vsub.f32 %v890_v44, %v896_v51 }
 0x6fb   :  { %v532_v54 = vpop.xlane.xlu0 %531 }
 0x6fc   :  { %v533_v56 = vmul.f32 0.03125, %v532_v54  ;;  %v898_v57 = vmul.f32 %v897_v52, %v897_v52 }
 0x6fe   :  { %v534_v58 = vadd.f32 1e-05, %v533_v56  ;;  %v899_v59 = vsel %vm51_vm0, %v898_v57, 0.0 }
 0x6ff   :  { %900 = vadd.xlane.f32.xlu1 %v899_v59  ;;  %v558_v11 = vpop.xlane.xlu0 %557 }
 0x700   :  { %1147 = vrsqrt.f32 %v534_v58  ;;  %v559_v12 = vrot.slane %v558_v11, 4 }
 0x702   :  { %v560_v13 = vadd.f32 %v559_v12, %v558_v11 }
 0x703   :  { %915 = vadd.xlane.f32.xlu1 %v914_v61 }
 0x704   :  { %v561_v17 = vrot.slane %v560_v13, 2 }
 0x706   :  { %v562_v20 = vadd.f32 %v561_v17, %v560_v13 }
 0x708   :  { %v563_v24 = vrot.slane %v562_v20, 1 }
 0x70a   :  { %v564_v28 = vadd.f32 %v563_v24, %v562_v20 }
 0x70d   :  { %v1148_v63 = vpop.eup %1147 }
 0x70e   :  { %v536_v1 = vmul.f32 %v1148_v63, %v528_v16 }
 0x710   :  { %v543_v3 = vmul.f32 %v973_v0, %v536_v1 }
 0x712   :  { %v550_v4 = vadd.f32 %v974_v2, %v543_v3 }
 0x714   :  { %551 = vst.msk [vmem:[#allocation2] sm:$0xff] %vm51_vm0, %v550_v4 }
 0x788   :  { %v901_v14 = vpop.xlane.xlu1 %900 }
 0x789   :  { %v902_v15 = vmul.f32 0.03125, %v901_v14 }
 0x78b   :  { %v903_v62 = vadd.f32 1e-05, %v902_v15 }
 0x78c   :  { %v916_v18 = vpop.xlane.xlu1 %915 }
 0x78d   :  { %1149 = vrsqrt.f32 %v903_v62  ;;  %v917_v55 = vrot.slane %v916_v18, 4 }
 0x78f   :  { %v918_v21 = vadd.f32 %v917_v55, %v916_v18 }
 0x791   :  { %v919_v22 = vrot.slane %v918_v21, 2 }
 0x793   :  { %v920_v25 = vadd.f32 %v919_v22, %v918_v21 }
 0x795   :  { %v921_v27 = vrot.slane %v920_v25, 1 }
 0x797   :  { %v922_v29 = vadd.f32 %v921_v27, %v920_v25 }
 0x799   :  { %v923_v30 = vadd.f32 %v922_v29, %v564_v28 }
 0x79a   :  { %v1150_v31 = vpop.eup %1149 }
 0x79b   :  { %v905_v32 = vmul.f32 %v1150_v31, %v897_v52  ;;  %925 = vst.msk [vmem:[#allocation4] sm:$0x1] %vm924_vm3, %v923_v30 }
 0x79c   :  { %1162 = shalt.err (!%p1159_p4)
}
 0x79d   :  { %947 = dma.vmem_to_hbm [thread:$0]  %s945_s8, 16, %s1478_s10, [#allocation5]   ;;  %v906_v8 = vmul.f32 %v973_v0, %v905_v32 }
 0x79e   :  { %s1171_s13 = scalar_lea.vmem %s932_s4, 256  ;;  %p1176_p6 = scmp.lt.s32.totalorder %s932_s4, %s932_s4 }
 0x79f   :  { %v907_v33 = vadd.f32 %v974_v2, %v906_v8  ;;  %p1172_p5 = scmp.ne.s32.totalorder %s932_s4, %s1171_s13  ;;  %p1177_p7 = scmp.lt.s32.totalorder %s1171_s13, %s1171_s13 }
 0x7a1   :  { %909 = vst.msk [vmem:[#allocation2 + $0x8] sm:$0xff] %vm51_vm0, %v907_v33  ;;  %p1178_p8 = por %p1177_p7, %p1176_p6 }
 0x7a3   :  { %p1179_p9 = pnand %p1178_p8, %p1172_p5 }
 0x7a5   :  { %1182 = shalt.err (!%p1179_p9)
}
 0x7a6   :  { %s1200_s14 = smov 128   ;;  %s1201_s15 = smov 8  }
 0x7a7   :  { %937 = dma.vmem_to_hbm [thread:$0]  %s932_s4, 256, %s1477_s9, [#allocation3], %s1200_s14, %s1200_s14, %s1201_s15  }
 0x7a8   :  { %1191 = dma.done.wait [#allocation3], 256  }
 0x7a9   :  { %1192 = vsyncadd [#allocation3], 4294967040 }
 0x7aa   :  { %1193 = dma.done.wait [#allocation5], 16  }
 0x7ab   :  { %1194 = vsyncadd [#allocation5], 4294967280 }
 0x7ac   :  { %954 = vsyncpa [#allocation3], 1 }
 0x7ad   :  { %955 = vsyncpa [#allocation5], 1 }

</bundles_post_ra>
